<compile_context>
chip_gen: v6e
topology: v6e:2x2x1
jax: 0.10.0
libtpu: 0.0.40
codegen_flags: <defaults>
</compile_context>

<pallas_src>
import functools

import jax
import jax.numpy as jnp
from jax import lax
from jax.experimental import pallas as pl
from jax.experimental.pallas import tpu as pltpu

_EPS = 1e-6


def _bce_partial_kernel(p_ref, t_ref, out_ref, *, n_rows, tm, ragged):
    """One (tm, L) tile -> per-block partial loss sum of shape (1, 1, L)."""
    p = p_ref[...].astype(jnp.float32)
    t = t_ref[...].astype(jnp.float32)

    if ragged:
        # Rows past n_rows belong to the padded tail of the last block;
        # replace them with safe values and zero their contribution.
        base = pl.program_id(0) * tm
        rows = base + lax.broadcasted_iota(jnp.int32, p.shape, 0)
        valid = rows < n_rows
        p = jnp.where(valid, p, 0.5)
        t = jnp.where(valid, t, 0.5)

    loss = -(t * jnp.log(p + _EPS) + (1.0 - t) * jnp.log(1.0 - p + _EPS))

    if ragged:
        loss = jnp.where(valid, loss, 0.0)

    # Reduce over rows only; keep the lane axis so the store is a vector,
    # the cross-lane work is finished once in the wrapper.
    out_ref[...] = jnp.sum(loss, axis=0)[None, None, :]


def _row_granularity(*dtypes):
    """Sublane tiling granularity for the row (second-minor) block dim."""
    g = 8
    for dt in dtypes:
        g = max(g, 8 * (4 // jnp.dtype(dt).itemsize))
    return g


def bce_loss(preds, targets, weight=1.0, *, tm=None):
    """preds, targets: (N, C, L). Returns scalar f32 of mean(BCE) * weight."""
    N, C, L = preds.shape
    M = N * C

    # Free reshape (no HBM copy), native dtype is streamed as-is.
    p2 = preds.reshape(M, L)
    t2 = targets.reshape(M, L)

    g = _row_granularity(p2.dtype, t2.dtype)

    if tm is None:
        # Keep the double-buffered working set (2 inputs x 2 buffers) well
        # inside VMEM on every generation (v7x has only 64 MiB physical).
        budget = 12 * 1024 * 1024
        bytes_per_row = 2 * L * (p2.dtype.itemsize + t2.dtype.itemsize)
        tm = min(2048, max(g, budget // max(1, bytes_per_row)))

    if M <= g:
        tm = M                      # single block == full array (always legal)
    else:
        tm = max(g, (min(tm, M) // g) * g)

    grid = pl.cdiv(M, tm)
    ragged = (M % tm) != 0

    kernel = functools.partial(_bce_partial_kernel, n_rows=M, tm=tm, ragged=ragged)

    partials = pl.pallas_call(
        kernel,
        out_shape=jax.ShapeDtypeStruct((grid, 1, L), jnp.float32),
        grid_spec=pltpu.PrefetchScalarGridSpec(
            num_scalar_prefetch=0,
            grid=(grid,),
            in_specs=[
                pl.BlockSpec((tm, L), lambda i: (i, 0)),
                pl.BlockSpec((tm, L), lambda i: (i, 0)),
            ],
            out_specs=pl.BlockSpec((1, 1, L), lambda i: (i, 0, 0)),
        ),
        compiler_params=pltpu.CompilerParams(
            dimension_semantics=("parallel",),
            vmem_limit_bytes=32 * 1024 * 1024,
        ),
    )(p2, t2)

    total = jnp.sum(partials)
    return total * jnp.float32(weight) / jnp.float32(N * C * L)


def _bce_ref(preds, targets, weight=1.0):
    p = preds.astype(jnp.float32)
    t = targets.astype(jnp.float32)
    loss = -(t * jnp.log(p + _EPS) + (1.0 - t) * jnp.log(1.0 - p + _EPS))
    return jnp.mean(loss) * jnp.float32(weight)


if __name__ == "__main__":
    key = jax.random.PRNGKey(0)

    # (N, C, L, dtype, weight) — small shapes consistent with (N, C, L) input.
    cases = [
        (2, 4, 100, jnp.float32, 1.0),    # aligned rows, single block
        (3, 3, 100, jnp.float32, 0.5),    # ragged rows -> 2 blocks + iota mask
        (4, 4, 128, jnp.bfloat16, 1.0),   # native bf16 ingestion
        (2, 3, 100, jnp.float32, 2.0),    # M < 8: full-array block
    ]

    for idx, (N, C, L, dtype, weight) in enumerate(cases):
        k1, k2 = jax.random.split(jax.random.fold_in(key, idx))
        preds = jax.nn.sigmoid(
            jax.random.normal(k1, (N, C, L), dtype=jnp.float32)
        ).astype(dtype)
        targets = (jax.random.uniform(k2, (N, C, L)) > 0.5).astype(dtype)

        out = jax.block_until_ready(bce_loss(preds, targets, weight))
        ref = _bce_ref(preds, targets, weight)
        assert jnp.allclose(out, ref, rtol=1e-5, atol=1e-6), (idx, out, ref)

    print("KERNEL_OK")
</pallas_src>

<mosaic_0001>
module attributes {stable_mosaic.version = 11 : i64} {
  func.func @_bce_partial_kernel(%arg0: i32, %arg1: memref<8x100xf32, #tpu.memory_space<vmem>>, %arg2: memref<8x100xf32, #tpu.memory_space<vmem>>, %arg3: memref<1x1x100xf32, #tpu.memory_space<vmem>>) attributes {dimension_semantics = [#tpu.dimension_semantics<parallel>], iteration_bounds = array<i64: 1>, scalar_prefetch = 0 : i64, scratch_operands = 0 : i64, tpu.core_type = #tpu.core_type<tc>, window_params = [{transform_indices = @transform_0, window_bounds = array<i64: 8, 100>}, {transform_indices = @transform_1, window_bounds = array<i64: 8, 100>}, {transform_indices = @transform_2, window_bounds = array<i64: 1, 1, 100>}]} {
    %c0 = arith.constant 0 : index
    %c0_0 = arith.constant 0 : index
    %0 = vector.load %arg1[%c0, %c0_0] : memref<8x100xf32, #tpu.memory_space<vmem>>, vector<8x100xf32>
    %c0_1 = arith.constant 0 : index
    %c0_2 = arith.constant 0 : index
    %1 = vector.load %arg2[%c0_1, %c0_2] : memref<8x100xf32, #tpu.memory_space<vmem>>, vector<8x100xf32>
    %cst = arith.constant 9.99999997E-7 : f32
    %2 = vector.broadcast %cst : f32 to vector<8x100xf32>
    %3 = arith.addf %0, %2 : vector<8x100xf32>
    %4 = math.log %3 : vector<8x100xf32>
    %5 = arith.mulf %1, %4 : vector<8x100xf32>
    %cst_3 = arith.constant 1.000000e+00 : f32
    %6 = vector.broadcast %cst_3 : f32 to vector<8x100xf32>
    %7 = arith.subf %6, %1 : vector<8x100xf32>
    %cst_4 = arith.constant 1.000000e+00 : f32
    %8 = vector.broadcast %cst_4 : f32 to vector<8x100xf32>
    %9 = arith.subf %8, %0 : vector<8x100xf32>
    %cst_5 = arith.constant 9.99999997E-7 : f32
    %10 = vector.broadcast %cst_5 : f32 to vector<8x100xf32>
    %11 = arith.addf %9, %10 : vector<8x100xf32>
    %12 = math.log %11 : vector<8x100xf32>
    %13 = arith.mulf %7, %12 : vector<8x100xf32>
    %14 = arith.addf %5, %13 : vector<8x100xf32>
    %cst_6 = arith.constant 0.000000e+00 : f32
    %15 = vector.broadcast %cst_6 : f32 to vector<8x100xf32>
    %16 = arith.subf %15, %14 : vector<8x100xf32>
    %cst_7 = arith.constant dense<0.000000e+00> : vector<100xf32>
    %17 = vector.multi_reduction <add>, %16, %cst_7 [0] : vector<8x100xf32> to vector<100xf32>
    %18 = vector.shape_cast %17 : vector<100xf32> to vector<1x1x100xf32>
    %c0_8 = arith.constant 0 : index
    %c0_9 = arith.constant 0 : index
    %c0_10 = arith.constant 0 : index
    %19 = vector.load %arg3[%c0_8, %c0_9, %c0_10] : memref<1x1x100xf32, #tpu.memory_space<vmem>>, vector<1x1x100xf32>
    tpu.vector_store %arg3[%c0_8, %c0_9, %c0_10], %18 {strides = array<i32>} : memref<1x1x100xf32, #tpu.memory_space<vmem>>, vector<1x1x100xf32>,
    return
  }
  func.func @transform_0(%arg0: i32) -> (i32, i32) {
    %c0_i32 = arith.constant 0 : i32
    %c0_i32_0 = arith.constant 0 : i32
    return %arg0, %c0_i32 : i32, i32
  }
  func.func @transform_1(%arg0: i32) -> (i32, i32) {
    %c0_i32 = arith.constant 0 : i32
    %c0_i32_0 = arith.constant 0 : i32
    return %arg0, %c0_i32 : i32, i32
  }
  func.func @transform_2(%arg0: i32) -> (i32, i32, i32) {
    %c0_i32 = arith.constant 0 : i32
    %c0_i32_0 = arith.constant 0 : i32
    %c0_i32_1 = arith.constant 0 : i32
    return %arg0, %c0_i32, %c0_i32_0 : i32, i32, i32
  }
}

</mosaic_0001>

<bundles_post_ra>
// kernel: tpu_custom_call.1
= control target key start
LH: loop header
LB: loop body
LE: loop exit
PB: predicated region body
PF: predicated region fallthrough
CT: control target
= control target key end

     0   :  { %7 = vsyncpa [#allocation3], 0  ;;  %s176_s0 = inlined_call_operand.hbm [shape: f32[8,100], index: 0, kind: input, shape index: {}]   ;;  %s177_s1 = inlined_call_operand.hbm [shape: f32[8,100], index: 1, kind: input, shape index: {}]   ;;  %s178_s2 = inlined_call_operand.hbm [shape: f32[1,1,100], index: 2, kind: output, shape index: {}]  }
   0x1   :  { %8 = vsyncpa [#allocation6], 0 }
   0x2   :  { %9 = vsyncpa [#allocation4], 0  ;;  %s149_s9 = smov [#allocation2]   ;;  %s150_s11 = smov [#allocation5]  }
   0x3   :  { %s16_s10 = sshll.u32 %s149_s9, 4  ;;  %s26_s12 = sshll.u32 %s150_s11, 4  ;;  %s17_s10 = int_to_ptr.vmem [resolvable:$true] %s16_s10  ;;  %s27_s12 = int_to_ptr.vmem [resolvable:$true] %s26_s12 }
   0x4   :  { %s91_s13 = scalar_lea.vmem %s17_s10, 128  ;;  %p96_p1 = scmp.lt.s32.totalorder %s17_s10, %s17_s10 }
   0x5   :  { %p92_p0 = scmp.ne.s32.totalorder %s17_s10, %s91_s13  ;;  %p97_p2 = scmp.lt.s32.totalorder %s91_s13, %s91_s13 }
   0x7   :  { %p98_p3 = por %p97_p2, %p96_p1 }
   0x9   :  { %p99_p4 = pnand %p98_p3, %p92_p0 }
   0xb   :  { %102 = shalt.err (!%p99_p4)
}
   0xc   :  { %19 = dma.hbm_to_vmem [thread:$0]  %s176_s0, 128, %s17_s10, [#allocation3]  }
   0xd   :  { %s111_s16 = scalar_lea.vmem %s27_s12, 128  ;;  %p116_p6 = scmp.lt.s32.totalorder %s27_s12, %s27_s12 }
   0xe   :  { %p112_p5 = scmp.ne.s32.totalorder %s27_s12, %s111_s16  ;;  %p117_p7 = scmp.lt.s32.totalorder %s111_s16, %s111_s16 }
  0x10   :  { %p118_p8 = por %p117_p7, %p116_p6 }
  0x12   :  { %p119_p9 = pnand %p118_p8, %p112_p5 }
  0x14   :  { %122 = shalt.err (!%p119_p9)
}
  0x15   :  { %29 = dma.hbm_to_vmem [thread:$0]  %s177_s1, 128, %s27_s12, [#allocation6]  }
  0x16   :  { %143 = dma.done.wait [#allocation3], 128  }
  0x17   :  { %144 = vsyncadd [#allocation3], 4294967168 }
  0x18   :  { %145 = dma.done.wait [#allocation6], 128  }
  0x19   :  { %146 = vsyncadd [#allocation6], 4294967168  ;;  %v36_v0 = vld [vmem:[#allocation2] sm:$0xff]  ;;  %v37_v4 = vld [vmem:[#allocation5] sm:$0xff]  ;;  %vm50_vm0 = vcmask 818176   ;;  %s151_s0 = smov [#allocation7]  }
  0x1a   :  { %v38_v1 = vadd.f32 1e-06, %v36_v0  ;;  %v43_v2 = vsub.f32 1.0, %v36_v0  ;;  %v42_v7 = vsub.f32 1.0, %v37_v4  ;;  %s66_s1 = sshll.u32 %s151_s0, 4  ;;  %vm58_vm1 = vcmask 811008   ;;  %s67_s1 = int_to_ptr.vmem [resolvable:$true] %s66_s1 }
  0x1b   :  { %s123_s19 = scalar_lea.vmem %s67_s1, 16  ;;  %s127_s20 = scalar_lea.vmem %s67_s1, 32 }
  0x1c   :  { %79 = vlog2.f32 %v38_v1  ;;  %v44_v3 = vadd.f32 1e-06, %v43_v2  ;;  %p124_p10 = scmp.ne.s32.totalorder %s67_s1, %s123_s19  ;;  %p128_p11 = scmp.lt.s32.totalorder %s67_s1, %s67_s1 }
  0x1d   :  { %p129_p12 = scmp.lt.s32.totalorder %s127_s20, %s123_s19 }
  0x1e   :  { %81 = vlog2.f32 %v44_v3 }
  0x1f   :  { %p130_p13 = por %p129_p12, %p128_p11 }
  0x21   :  { %p131_p0 = pnand %p130_p13, %p124_p10 }
  0x29   :  { %v80_v5 = vpop.eup %79 }
  0x2a   :  { %v40_v6 = vmul.f32 0.6931472, %v80_v5 }
  0x2b   :  { %v82_v8 = vpop.eup %81 }
  0x2c   :  { %v41_v9 = vmul.f32 %v40_v6, %v37_v4  ;;  %v46_v10 = vmul.f32 0.6931472, %v82_v8 }
  0x2e   :  { %v47_v11 = vmul.f32 %v46_v10, %v42_v7 }
  0x30   :  { %v48_v12 = vadd.f32 %v47_v11, %v41_v9 }
  0x32   :  { %v49_v13 = vsub.f32 0.0, %v48_v12 }
  0x34   :  { %v51_v14 = vsel %vm50_vm0, %v49_v13, 0.0 }
  0x35   :  { %v52_v15 = vrot.slane %v51_v14, 4 }
  0x37   :  { %v53_v16 = vadd.f32 %v52_v15, %v51_v14 }
  0x39   :  { %v54_v17 = vrot.slane %v53_v16, 2 }
  0x3b   :  { %v55_v18 = vadd.f32 %v54_v17, %v53_v16 }
  0x3d   :  { %v56_v19 = vrot.slane %v55_v18, 1 }
  0x3f   :  { %v57_v20 = vadd.f32 %v56_v19, %v55_v18 }
  0x41   :  { %59 = vst.msk [vmem:[#allocation7] sm:$0x1] %vm58_vm1, %v57_v20 }
  0x42   :  { %134 = shalt.err (!%p131_p0)
}
  0x43   :  { %69 = dma.vmem_to_hbm [thread:$0]  %s67_s1, 16, %s178_s2, [#allocation4]  }
  0x44   :  { %147 = dma.done.wait [#allocation4], 16  }
  0x45   :  { %148 = vsyncadd [#allocation4], 4294967280 }
  0x46   :  { %73 = vsyncpa [#allocation3], 1 }
  0x47   :  { %74 = vsyncpa [#allocation6], 1 }
  0x48   :  { %75 = vsyncpa [#allocation4], 1 }

</bundles_post_ra>
